<compile_context>
chip_gen: v6e
topology: v6e:2x2x1
jax: 0.10.0
libtpu: 0.0.40
codegen_flags: <defaults>
</compile_context>

<pallas_src>
import functools

import jax
import jax.numpy as jnp
from jax.experimental import pallas as pl
from jax.experimental.pallas import tpu as pltpu

_LANE = 128                       # lane width: hidden feature dims padded to this
_SUBLANE = 8                      # f32 sublane height: batch-tile alignment
_MAX_TB = 256                     # (256,128) f32 h = 32 vregs -> no spills
_VMEM_LIMIT = 32 * 1024 * 1024    # explicit scoped-VMEM limit (all generations)
_VMEM_BUDGET = 24 * 1024 * 1024   # what tiles + params may use (headroom kept)


def _round_up(n, m):
    return (n + m - 1) // m * m


def _mlp_fused_kernel(x_ref, *refs, n_layers: int, neg_slope: float):
    """Fused MLP body.  refs = (w0, b0, w1, b1, ..., out_ref).

    Weights are bf16 (in_pad, out_pad); biases f32 (1, out_pad).  Intermediates
    stay in vregs: matmuls run bf16 x bf16 -> f32 accumulate on the MXU, bias
    add + LeakyReLU run in f32 on the VPU.
    """
    o_ref = refs[-1]
    h = x_ref[...].astype(jnp.float32)                       # (tb, in_f)
    for i in range(n_layers):
        w = refs[2 * i][...]                                 # bf16 (in_i, out_i)
        b = refs[2 * i + 1][...]                             # f32  (1, out_i)
        h = jnp.dot(h.astype(w.dtype), w,
                    preferred_element_type=jnp.float32) + b
        if i < n_layers - 1:                                 # LeakyReLU(0.2)
            h = jnp.where(h >= 0, h, h * neg_slope)
    o_ref[...] = h.astype(o_ref.dtype)


def mlp_pallas(x, packed_params, *, neg_slope: float = 0.2):
    """Fused MLP forward.

    x:             (B, in_features) activations (NOT padded).
    packed_params: list of (w_pad, b_pad) from prepare_mlp_params:
                   w_pad bf16 (in_pad_i, out_pad_i), b_pad f32 (1, out_pad_i).
                   Layer 0 keeps the true in_features; the last layer keeps the
                   true out_features; hidden dims are padded to 128 lanes.
    Returns (B, out_features).
    """
    B, in_f = x.shape
    n_layers = len(packed_params)
    assert in_f == packed_params[0][0].shape[0]
    out_f = packed_params[-1][0].shape[1]

    flat_params = [a for wb in packed_params for a in wb]
    # Pallas double-buffers the (constant-index) param blocks too; count 2x.
    param_bytes = 2 * sum(p.size * p.dtype.itemsize for p in flat_params)

    # ---- batch tiling: fixed sublane-aligned tile, VMEM-budget capped ----
    tb = min(B, _MAX_TB)
    per_row = 2 * (in_f * x.dtype.itemsize + out_f * x.dtype.itemsize)  # 2 bufs
    max_rows = max(_VMEM_BUDGET - param_bytes, per_row) // per_row
    max_rows = max(_SUBLANE, max_rows // _SUBLANE * _SUBLANE)
    tb = max(1, min(tb, max_rows))
    grid = (pl.cdiv(B, tb),)

    # Weights / biases: constant index_map -> fetched once, VMEM-resident.
    param_specs = [pl.BlockSpec(p.shape, lambda i: (0, 0)) for p in flat_params]

    flops = sum(2 * B * w.shape[0] * w.shape[1] for w, _ in packed_params)
    bytes_accessed = (
        x.size * x.dtype.itemsize
        + sum(p.size * p.dtype.itemsize for p in flat_params)
        + B * out_f * x.dtype.itemsize
    )

    kernel = functools.partial(
        _mlp_fused_kernel, n_layers=n_layers, neg_slope=neg_slope
    )

    return pl.pallas_call(
        kernel,
        out_shape=jax.ShapeDtypeStruct((B, out_f), x.dtype),
        grid_spec=pltpu.PrefetchScalarGridSpec(
            num_scalar_prefetch=0,
            grid=grid,
            in_specs=[pl.BlockSpec((tb, in_f), lambda i: (i, 0))] + param_specs,
            out_specs=pl.BlockSpec((tb, out_f), lambda i: (i, 0)),
        ),
        compiler_params=pltpu.CompilerParams(
            dimension_semantics=("parallel",),
            vmem_limit_bytes=_VMEM_LIMIT,
        ),
        cost_estimate=pl.CostEstimate(
            flops=int(flops), transcendentals=0, bytes_accessed=int(bytes_accessed)
        ),
    )(x, *flat_params)


def make_mlp_forward(layers, *, neg_slope: float = 0.2):
    """Build a jitted forward reproducing MLP.forward for `layers`."""
    del layers  # output dim comes from the packed params (unpadded last layer)

    @jax.jit
    def forward(x, packed_params):
        return mlp_pallas(x, packed_params, neg_slope=neg_slope)

    return forward


def init_mlp_params(key, layers, last_init_div: float = 1.0, dtype=jnp.float32):
    """Deterministic params mimicking torch.nn.Linear default init
    (U(-1/sqrt(fan_in), 1/sqrt(fan_in))), torch layout (out, in)."""
    params = []
    n = len(layers)
    for i in range(1, n):
        fan_in, fan_out = layers[i - 1], layers[i]
        key, kw, kb = jax.random.split(key, 3)
        bound = float(1.0 / (fan_in ** 0.5))
        w = jax.random.uniform(kw, (fan_out, fan_in), dtype, -bound, bound)
        b = jax.random.uniform(kb, (fan_out,), dtype, -bound, bound)
        if i == n - 1:  # matches div_param on the last layer
            w = w / last_init_div
            b = b / last_init_div
        params.append((w, b))
    return params


def prepare_mlp_params(params, weight_dtype=jnp.bfloat16, bias_dtype=jnp.float32):
    """One-time packing: transpose torch (out, in) -> (in, out), cast weights
    to bf16 (MXU-native), keep biases f32.  Hidden dims are zero-padded to 128
    lanes; layer 0 keeps the true in_features and the last layer keeps the
    true out_features.  Zero padding is numerically exact."""
    n = len(params)
    packed = []
    for i, (w, b) in enumerate(params):
        out_f, in_f = w.shape
        in_pad = in_f if i == 0 else _round_up(in_f, _LANE)
        out_pad = out_f if i == n - 1 else _round_up(out_f, _LANE)
        w_t = jnp.zeros((in_pad, out_pad), weight_dtype).at[:in_f, :out_f].set(
            w.T.astype(weight_dtype))
        b_p = jnp.zeros((1, out_pad), bias_dtype).at[0, :out_f].set(
            b.astype(bias_dtype))
        packed.append((w_t, b_p))
    return packed


if __name__ == "__main__":
    key = jax.random.PRNGKey(0)
    layers = [32, 64, 64, 16]   # MLP([32, 64, 64, 16])

    kx, kp = jax.random.split(key)
    params = init_mlp_params(kp, layers, last_init_div=1.0)   # torch layout
    packed = prepare_mlp_params(params)                       # pack once (bf16)
    forward = make_mlp_forward(layers)                        # jitted, fused

    def ref_forward(xx):  # pure-JAX f32 reference (torch-equivalent math)
        h = xx
        for idx, (w, b) in enumerate(params):
            h = h @ w.T + b
            if idx < len(params) - 1:
                h = jnp.where(h >= 0, h, 0.2 * h)
        return h

    # Small batch (single tile) and a larger batch (multi-tile grid path).
    for batch in (8, 512):
        x = jax.random.normal(jax.random.fold_in(kx, batch),
                              (batch, layers[0]), jnp.float32)
        out = jax.block_until_ready(forward(x, packed))
        ref = ref_forward(x)
        assert out.shape == (batch, layers[-1])
        # bf16 matmul operands with f32 accumulation -> loose tolerance vs f32 ref.
        assert jnp.allclose(out, ref, atol=5e-2, rtol=5e-2), (
            batch, float(jnp.max(jnp.abs(out - ref))))

    # TODO(synk): save_model / load_model / set_optimizer / epoch are torch
    # checkpointing & optimizer plumbing with no kernel equivalent.
    print("KERNEL_OK")
</pallas_src>

<mosaic_0001>
module attributes {stable_mosaic.version = 11 : i64} {
  func.func @_mlp_fused_kernel(%arg0: i32, %arg1: memref<8x32xf32, #tpu.memory_space<vmem>>, %arg2: memref<32x128xbf16, #tpu.memory_space<vmem>>, %arg3: memref<1x128xf32, #tpu.memory_space<vmem>>, %arg4: memref<128x128xbf16, #tpu.memory_space<vmem>>, %arg5: memref<1x128xf32, #tpu.memory_space<vmem>>, %arg6: memref<128x16xbf16, #tpu.memory_space<vmem>>, %arg7: memref<1x16xf32, #tpu.memory_space<vmem>>, %arg8: memref<8x16xf32, #tpu.memory_space<vmem>>) attributes {dimension_semantics = [#tpu.dimension_semantics<parallel>], iteration_bounds = array<i64: 1>, scalar_prefetch = 0 : i64, scratch_operands = 0 : i64, tpu.core_type = #tpu.core_type<tc>, window_params = [{transform_indices = @transform_0, window_bounds = array<i64: 8, 32>}, {pipeline_mode = #tpu.pipeline_mode<synchronous>, transform_indices = @transform_1, window_bounds = array<i64: 32, 128>}, {pipeline_mode = #tpu.pipeline_mode<synchronous>, transform_indices = @transform_2, window_bounds = array<i64: 1, 128>}, {pipeline_mode = #tpu.pipeline_mode<synchronous>, transform_indices = @transform_3, window_bounds = array<i64: 128, 128>}, {pipeline_mode = #tpu.pipeline_mode<synchronous>, transform_indices = @transform_4, window_bounds = array<i64: 1, 128>}, {pipeline_mode = #tpu.pipeline_mode<synchronous>, transform_indices = @transform_5, window_bounds = array<i64: 128, 16>}, {pipeline_mode = #tpu.pipeline_mode<synchronous>, transform_indices = @transform_6, window_bounds = array<i64: 1, 16>}, {transform_indices = @transform_7, window_bounds = array<i64: 8, 16>}]} {
    %c0 = arith.constant 0 : index
    %c0_0 = arith.constant 0 : index
    %0 = vector.load %arg1[%c0, %c0_0] : memref<8x32xf32, #tpu.memory_space<vmem>>, vector<8x32xf32>
    %c0_1 = arith.constant 0 : index
    %c0_2 = arith.constant 0 : index
    %1 = vector.load %arg2[%c0_1, %c0_2] : memref<32x128xbf16, #tpu.memory_space<vmem>>, vector<32x128xbf16>
    %c0_3 = arith.constant 0 : index
    %c0_4 = arith.constant 0 : index
    %2 = vector.load %arg3[%c0_3, %c0_4] : memref<1x128xf32, #tpu.memory_space<vmem>>, vector<1x128xf32>
    %3 = arith.truncf %0 : vector<8x32xf32> to vector<8x32xbf16>
    %cst = arith.constant dense<0.000000e+00> : vector<8x128xf32>
    %4 = tpu.matmul %3, %1, %cst {dimension_numbers = #tpu.dot_dimension_numbers<[1], [0], [0], [1], [0, 0, 1, 1], [], []>} : vector<8x32xbf16>, vector<32x128xbf16>, vector<8x128xf32> -> vector<8x128xf32>
    %5 = vector.broadcast %2 : vector<1x128xf32> to vector<8x128xf32>
    %6 = arith.addf %4, %5 : vector<8x128xf32>
    %cst_5 = arith.constant 0.000000e+00 : f32
    %7 = vector.broadcast %cst_5 : f32 to vector<8x128xf32>
    %8 = arith.cmpf oge, %6, %7 : vector<8x128xf32>
    %cst_6 = arith.constant 2.000000e-01 : f32
    %9 = vector.broadcast %cst_6 : f32 to vector<8x128xf32>
    %10 = arith.mulf %6, %9 : vector<8x128xf32>
    %11 = arith.select %8, %6, %10 : vector<8x128xi1>, vector<8x128xf32>
    %c0_7 = arith.constant 0 : index
    %c0_8 = arith.constant 0 : index
    %12 = vector.load %arg4[%c0_7, %c0_8] : memref<128x128xbf16, #tpu.memory_space<vmem>>, vector<128x128xbf16>
    %c0_9 = arith.constant 0 : index
    %c0_10 = arith.constant 0 : index
    %13 = vector.load %arg5[%c0_9, %c0_10] : memref<1x128xf32, #tpu.memory_space<vmem>>, vector<1x128xf32>
    %14 = arith.truncf %11 : vector<8x128xf32> to vector<8x128xbf16>
    %cst_11 = arith.constant dense<0.000000e+00> : vector<8x128xf32>
    %15 = tpu.matmul %14, %12, %cst_11 {dimension_numbers = #tpu.dot_dimension_numbers<[1], [0], [0], [1], [0, 0, 1, 1], [], []>} : vector<8x128xbf16>, vector<128x128xbf16>, vector<8x128xf32> -> vector<8x128xf32>
    %16 = vector.broadcast %13 : vector<1x128xf32> to vector<8x128xf32>
    %17 = arith.addf %15, %16 : vector<8x128xf32>
    %cst_12 = arith.constant 0.000000e+00 : f32
    %18 = vector.broadcast %cst_12 : f32 to vector<8x128xf32>
    %19 = arith.cmpf oge, %17, %18 : vector<8x128xf32>
    %cst_13 = arith.constant 2.000000e-01 : f32
    %20 = vector.broadcast %cst_13 : f32 to vector<8x128xf32>
    %21 = arith.mulf %17, %20 : vector<8x128xf32>
    %22 = arith.select %19, %17, %21 : vector<8x128xi1>, vector<8x128xf32>
    %c0_14 = arith.constant 0 : index
    %c0_15 = arith.constant 0 : index
    %23 = vector.load %arg6[%c0_14, %c0_15] : memref<128x16xbf16, #tpu.memory_space<vmem>>, vector<128x16xbf16>
    %c0_16 = arith.constant 0 : index
    %c0_17 = arith.constant 0 : index
    %24 = vector.load %arg7[%c0_16, %c0_17] : memref<1x16xf32, #tpu.memory_space<vmem>>, vector<1x16xf32>
    %25 = arith.truncf %22 : vector<8x128xf32> to vector<8x128xbf16>
    %cst_18 = arith.constant dense<0.000000e+00> : vector<8x16xf32>
    %26 = tpu.matmul %25, %23, %cst_18 {dimension_numbers = #tpu.dot_dimension_numbers<[1], [0], [0], [1], [0, 0, 1, 1], [], []>} : vector<8x128xbf16>, vector<128x16xbf16>, vector<8x16xf32> -> vector<8x16xf32>
    %27 = vector.broadcast %24 : vector<1x16xf32> to vector<8x16xf32>
    %28 = arith.addf %26, %27 : vector<8x16xf32>
    %c0_19 = arith.constant 0 : index
    %c0_20 = arith.constant 0 : index
    %29 = vector.load %arg8[%c0_19, %c0_20] : memref<8x16xf32, #tpu.memory_space<vmem>>, vector<8x16xf32>
    tpu.vector_store %arg8[%c0_19, %c0_20], %28 {strides = array<i32>} : memref<8x16xf32, #tpu.memory_space<vmem>>, vector<8x16xf32>,
    return
  }
  func.func @transform_0(%arg0: i32) -> (i32, i32) {
    %c0_i32 = arith.constant 0 : i32
    %c0_i32_0 = arith.constant 0 : i32
    return %arg0, %c0_i32 : i32, i32
  }
  func.func @transform_1(%arg0: i32) -> (i32, i32) {
    %c0_i32 = arith.constant 0 : i32
    %c0_i32_0 = arith.constant 0 : i32
    %c0_i32_1 = arith.constant 0 : i32
    return %c0_i32, %c0_i32_0 : i32, i32
  }
  func.func @transform_2(%arg0: i32) -> (i32, i32) {
    %c0_i32 = arith.constant 0 : i32
    %c0_i32_0 = arith.constant 0 : i32
    %c0_i32_1 = arith.constant 0 : i32
    return %c0_i32, %c0_i32_0 : i32, i32
  }
  func.func @transform_3(%arg0: i32) -> (i32, i32) {
    %c0_i32 = arith.constant 0 : i32
    %c0_i32_0 = arith.constant 0 : i32
    %c0_i32_1 = arith.constant 0 : i32
    return %c0_i32, %c0_i32_0 : i32, i32
  }
  func.func @transform_4(%arg0: i32) -> (i32, i32) {
    %c0_i32 = arith.constant 0 : i32
    %c0_i32_0 = arith.constant 0 : i32
    %c0_i32_1 = arith.constant 0 : i32
    return %c0_i32, %c0_i32_0 : i32, i32
  }
  func.func @transform_5(%arg0: i32) -> (i32, i32) {
    %c0_i32 = arith.constant 0 : i32
    %c0_i32_0 = arith.constant 0 : i32
    %c0_i32_1 = arith.constant 0 : i32
    return %c0_i32, %c0_i32_0 : i32, i32
  }
  func.func @transform_6(%arg0: i32) -> (i32, i32) {
    %c0_i32 = arith.constant 0 : i32
    %c0_i32_0 = arith.constant 0 : i32
    %c0_i32_1 = arith.constant 0 : i32
    return %c0_i32, %c0_i32_0 : i32, i32
  }
  func.func @transform_7(%arg0: i32) -> (i32, i32) {
    %c0_i32 = arith.constant 0 : i32
    %c0_i32_0 = arith.constant 0 : i32
    return %arg0, %c0_i32 : i32, i32
  }
}

</mosaic_0001>

<bundles_post_ra>
// kernel: forward.1
= control target key start
LH: loop header
LB: loop body
LE: loop exit
PB: predicated region body
PF: predicated region fallthrough
CT: control target
= control target key end

     0   :  { %12 = vsyncpa [#allocation3], 0  ;;  %s690_s0 = inlined_call_operand.vmem [shape: f32[8,32], index: 0, kind: input, shape index: {}]   ;;  %s691_s1 = inlined_call_operand.hbm [shape: bf16[32,128], index: 1, kind: input, shape index: {}]   ;;  %s692_s2 = inlined_call_operand.vmem [shape: f32[1,128], index: 2, kind: input, shape index: {}]   ;;  %s693_s3 = inlined_call_operand.vmem [shape: bf16[128,128], index: 3, kind: input, shape index: {}]   ;;  %s694_s4 = inlined_call_operand.hbm [shape: f32[1,128], index: 4, kind: input, shape index: {}]   ;;  %s695_s5 = inlined_call_operand.vmem [shape: bf16[128,16], index: 5, kind: input, shape index: {}]   ;;  %s696_s6 = inlined_call_operand.vmem [shape: f32[1,16], index: 6, kind: input, shape index: {}]   ;;  %s697_s7 = inlined_call_operand.hbm [shape: f32[8,16], index: 7, kind: output, shape index: {}]  }
   0x1   :  { %13 = vsyncpa [#allocation6], 0 }
   0x2   :  { %14 = vsyncpa [#allocation4], 0  ;;  %s553_s24 = smov [#allocation2]  }
   0x3   :  { %s22_s25 = sshll.u32 %s553_s24, 4  ;;  %s23_s25 = int_to_ptr.vmem [resolvable:$true] %s22_s25 }
   0x4   :  { %s495_s26 = scalar_lea.vmem %s23_s25, 256  ;;  %p500_p1 = scmp.lt.s32.totalorder %s23_s25, %s23_s25 }
   0x5   :  { %p496_p0 = scmp.ne.s32.totalorder %s23_s25, %s495_s26  ;;  %p501_p2 = scmp.lt.s32.totalorder %s495_s26, %s495_s26 }
   0x7   :  { %p502_p3 = por %p501_p2, %p500_p1 }
   0x9   :  { %p503_p4 = pnand %p502_p3, %p496_p0 }
   0xb   :  { %506 = shalt.err (!%p503_p4)
}
   0xc   :  { %s554_s27 = smov 64   ;;  %s555_s28 = smov 4  }
   0xd   :  { %28 = dma.hbm_to_vmem [thread:$0]  %s691_s1, 256, %s23_s25, [#allocation3], %s554_s27, %s554_s27, %s555_s28  }
   0xe   :  { %s556_s8 = smov [#allocation5]  }
   0xf   :  { %s39_s9 = sshll.u32 %s556_s8, 4  ;;  %s40_s9 = int_to_ptr.vmem [resolvable:$true] %s39_s9 }
  0x10   :  { %s515_s10 = scalar_lea.vmem %s40_s9, 16  ;;  %s519_s11 = scalar_lea.vmem %s40_s9, 32 }
  0x11   :  { %p516_p5 = scmp.ne.s32.totalorder %s40_s9, %s515_s10  ;;  %p520_p6 = scmp.lt.s32.totalorder %s40_s9, %s40_s9 }
  0x12   :  { %p521_p7 = scmp.lt.s32.totalorder %s519_s11, %s515_s10 }
  0x14   :  { %p522_p8 = por %p521_p7, %p520_p6 }
  0x16   :  { %p523_p9 = pnand %p522_p8, %p516_p5 }
  0x18   :  { %526 = shalt.err (!%p523_p9)
}
  0x19   :  { %42 = dma.hbm_to_vmem [thread:$0]  %s694_s4, 16, %s40_s9, [#allocation6]  }
  0x1a   :  { %547 = dma.done.wait [#allocation3], 256  }
  0x1b   :  { %548 = vsyncadd [#allocation3], 4294967040 }
  0x1c   :  { %549 = dma.done.wait [#allocation6], 16  }
  0x1d   :  { %550 = vsyncadd [#allocation6], 4294967280  ;;  %v557_v0 = vmov 0.0   ;;  %vm558_vm0 = vmmov 0   ;;  %v469_v1 = vld [vmem:[#allocation2 + $0x8] sm:$0xff]   ;;  %v470_v2 = vld [vmem:[#allocation2] sm:$0xff]  }
  0x1e   :  { %414 = vmatprep.subr.bf16.mxu0 %v557_v0  ;;  %418 = vmatprep.mubr.msk.bf16.mxu0 %vm558_vm0, %v557_v0  ;;  %v54_v3 = vld [vmem:[%s690_s0] sm:$0xff]  ;;  %v471_v4 = vld [vmem:[%s693_s3 + $0x38] sm:$0xff]   ;;  %v472_v6 = vld [vmem:[%s693_s3 + $0x30] sm:$0xff]   ;;  %vm79_vm1 = vcmask 261120   ;;  %s559_s21 = smov [#allocation7]   ;;  %vm353_vm4 = vcmask 130048  }
  0x1f   :  { %422 = vmatprep.subr.bf16.mxu1 %v557_v0  ;;  %438 = vmatprep.mubr.msk.bf16.mxu1 %vm558_vm0, %v557_v0  ;;  %v60_v5 = vpack.c.bf16 %v54_v3, %v54_v3  ;;  %v473_v7 = vld [vmem:[%s693_s3 + $0x28] sm:$0xff]   ;;  %v474_v8 = vld [vmem:[%s693_s3 + $0x20] sm:$0xff]   ;;  %v475_v9 = vld [vmem:[%s693_s3 + $0x18] sm:$0xff]   ;;  %s361_s22 = sshll.u32 %s559_s21, 4  ;;  %s362_s22 = int_to_ptr.vmem [resolvable:$true] %s361_s22 }
  0x20   :  { %415 = vmatpush3.bf16.msra.mxu0 %v469_v1  ;;  %423 = vmatpush3.bf16.msra.mxu1 %v471_v4  ;;  %v476_v10 = vld [vmem:[%s693_s3 + $0x10] sm:$0xff]   ;;  %v477_v11 = vld [vmem:[%s693_s3 + $0x8] sm:$0xff]   ;;  %v478_v12 = vld [vmem:[%s693_s3] sm:$0xff]   ;;  %p532_p11 = scmp.lt.s32.totalorder %s362_s22, %s362_s22 }
  0x21   :  { %416 = vmatprep.subr.bf16.mxu0 %v557_v0  ;;  %424 = vmatprep.subr.bf16.mxu1 %v557_v0  ;;  %v479_v13 = vld [vmem:[%s695_s5 + $0x38] sm:$0xff]   ;;  %v480_v14 = vld [vmem:[%s695_s5 + $0x30] sm:$0xff]   ;;  %v481_v15 = vld [vmem:[%s695_s5 + $0x28] sm:$0xff]  }
  0x22   :  { %v482_v16 = vld [vmem:[%s695_s5 + $0x20] sm:$0xff]   ;;  %v483_v17 = vld [vmem:[%s695_s5 + $0x18] sm:$0xff]   ;;  %v484_v18 = vld [vmem:[%s695_s5 + $0x10] sm:$0xff]  }
  0x23   :  { %v371_v19 = vld [vmem:[%s692_s2] ss:$0 sm:$0xff]  ;;  %v485_v28 = vld [vmem:[%s695_s5 + $0x8] sm:$0xff]   ;;  %v375_v30 = vld [vmem:[#allocation5] ss:$0 sm:$0xff] }
  0x24   :  { %417 = vmatpush3.bf16.msra.mxu0 %v470_v2  ;;  %425 = vmatpush3.bf16.msra.mxu1 %v472_v6  ;;  %v486_v29 = vld [vmem:[%s695_s5] sm:$0xff]   ;;  %s527_s5 = scalar_lea.vmem %s362_s22, 128 }
  0x25   :  { %442 = vmatprep.subr.bf16.mxu0 %v557_v0  ;;  %426 = vmatprep.subr.bf16.mxu1 %v557_v0  ;;  %v384_v39 = vld [vmem:[%s696_s6] ss:$0 sm:$0xff]  ;;  %p528_p10 = scmp.ne.s32.totalorder %s362_s22, %s527_s5  ;;  %p533_p12 = scmp.lt.s32.totalorder %s527_s5, %s527_s5 }
  0x27   :  { %419 = vmatmul.mubr.msk.bf16.vlgmr.msra.gmra.mxu0 %vm79_vm1, %v60_v5  ;;  %p534_p13 = por %p533_p12, %p532_p11 }
  0x28   :  { %458 = vmatprep.mubr.msk.bf16.mxu0 %vm558_vm0, %v557_v0  ;;  %427 = vmatpush3.bf16.msra.mxu1 %v473_v7 }
  0x29   :  { %428 = vmatprep.subr.bf16.mxu1 %v557_v0  ;;  %443 = vmatpush3.bf16.msra.mxu0 %v479_v13  ;;  %p535_p0 = pnand %p534_p13, %p528_p10 }
  0x2a   :  { %444 = vmatprep.subr.bf16.mxu0 %v557_v0 }
  0x2c   :  { %429 = vmatpush3.bf16.msra.mxu1 %v474_v8 }
  0x2d   :  { %430 = vmatprep.subr.bf16.mxu1 %v557_v0  ;;  %445 = vmatpush3.bf16.msra.mxu0 %v480_v14 }
  0x2e   :  { %446 = vmatprep.subr.bf16.mxu0 %v557_v0 }
  0x30   :  { %431 = vmatpush3.bf16.msra.mxu1 %v475_v9 }
  0x31   :  { %432 = vmatprep.subr.bf16.mxu1 %v557_v0  ;;  %447 = vmatpush3.bf16.msra.mxu0 %v481_v15 }
  0x32   :  { %448 = vmatprep.subr.bf16.mxu0 %v557_v0 }
  0x34   :  { %433 = vmatpush3.bf16.msra.mxu1 %v476_v10 }
  0x35   :  { %434 = vmatprep.subr.bf16.mxu1 %v557_v0  ;;  %449 = vmatpush3.bf16.msra.mxu0 %v482_v16 }
  0x36   :  { %450 = vmatprep.subr.bf16.mxu0 %v557_v0 }
  0x38   :  { %435 = vmatpush3.bf16.msra.mxu1 %v477_v11 }
  0x39   :  { %436 = vmatprep.subr.bf16.mxu1 %v557_v0  ;;  %451 = vmatpush3.bf16.msra.mxu0 %v483_v17 }
  0x3a   :  { %452 = vmatprep.subr.bf16.mxu0 %v557_v0 }
  0x3c   :  { %437 = vmatpush3.bf16.msra.mxu1 %v478_v12 }
  0x3d   :  { %453 = vmatpush3.bf16.msra.mxu0 %v484_v18 }
  0x3e   :  { %454 = vmatprep.subr.bf16.mxu0 %v557_v0 }
  0x41   :  { %455 = vmatpush3.bf16.msra.mxu0 %v485_v28 }
  0x42   :  { %456 = vmatprep.subr.bf16.mxu0 %v557_v0 }
  0x45   :  { %457 = vmatpush3.bf16.msra.mxu0 %v486_v29 }
  0xe7   :  { %v117_v20 = vpop.f32.mrf.mxu0 }
  0xe8   :  { %v118_v21 = vadd.f32 %v371_v19, %v117_v20 }
  0xe9   :  { %v420_v22 = vpop.f32.mrf.mxu0 }
  0xea   :  { %vm123_vm2 = vcmp.ge.f32.partialorder %v118_v21, 0.0  ;;  %v124_v23 = vmul.f32 0.2, %v118_v21 }
  0xeb   :  { %v120_v24 = vpop.f32.mrf.mxu0 }
  0xec   :  { %v125_v25 = vsel %vm123_vm2, %v118_v21, %v124_v23 }
  0xed   :  { %v421_v26 = vpop.f32.mrf.mxu0  ;;  %v143_v27 = vpack.c.bf16 %v125_v25, %v125_v25 }
  0xef   :  { %439 = vmatmul.mubr.bf16.vlgmr.msra.gmra.mxu1 %v143_v27 }
 0x1af   :  { %v232_v31 = vpop.f32.mrf.mxu1 }
 0x1b0   :  { %v233_v32 = vadd.f32 %v375_v30, %v232_v31 }
 0x1b1   :  { %v440_v33 = vpop.f32.mrf.mxu1 }
 0x1b2   :  { %vm238_vm3 = vcmp.ge.f32.partialorder %v233_v32, 0.0  ;;  %v239_v34 = vmul.f32 0.2, %v233_v32 }
 0x1b3   :  { %v235_v35 = vpop.f32.mrf.mxu1 }
 0x1b4   :  { %v240_v36 = vsel %vm238_vm3, %v233_v32, %v239_v34 }
 0x1b5   :  { %v258_v37 = vpack.c.bf16 %v240_v36, %v240_v36  ;;  %v441_v38 = vpop.f32.mrf.mxu1 }
 0x1b7   :  { %459 = vmatmul.mubr.bf16.vlgmr.msra.gmra.mxu0 %v258_v37 }
 0x277   :  { %v347_v40 = vpop.f32.mrf.mxu0 }
 0x278   :  { %v348_v41 = vadd.f32 %v384_v39, %v347_v40 }
 0x279   :  { %v460_v42 = vpop.f32.mrf.mxu0 }
 0x27a   :  { %354 = vst.msk [vmem:[#allocation7] sm:$0xff] %vm353_vm4, %v348_v41 }
 0x27b   :  { %v350_v43 = vpop.f32.mrf.mxu0 }
 0x27c   :  { %538 = shalt.err (!%p535_p0)
}
 0x27d   :  { %364 = dma.vmem_to_hbm [thread:$0]  %s362_s22, 128, %s697_s7, [#allocation4]   ;;  %v461_v44 = vpop.f32.mrf.mxu0 }
 0x27e   :  { %551 = dma.done.wait [#allocation4], 128  }
 0x27f   :  { %552 = vsyncadd [#allocation4], 4294967168 }
 0x280   :  { %368 = vsyncpa [#allocation3], 1 }
 0x281   :  { %369 = vsyncpa [#allocation6], 1 }
 0x282   :  { %370 = vsyncpa [#allocation4], 1 }

</bundles_post_ra>
